<compile_context>
chip_gen: v7x
topology: tpu7x:2x2x1
jax: 0.10.0
libtpu: 0.0.40
codegen_flags: <defaults>
</compile_context>

<pallas_src>
import functools

import jax
import jax.numpy as jnp
from jax.experimental import pallas as pl
from jax.experimental.pallas import tpu as pltpu


def _mlp_kernel(x_ref, w1_ref, b1_ref, w2_ref, b2_ref, w3_ref, b3_ref, o_ref):
    x = x_ref[...]                                    # (2, TB)  batch on lanes

    # Layer 1: in_features = 2 -> VPU broadcast-FMA instead of a K=2 MXU pass.
    #   h1[j, :] = w1[j,0]*x[0,:] + w1[j,1]*x[1,:] + b1[j]
    h1 = (w1_ref[:, 0:1] * x[0:1, :]
          + w1_ref[:, 1:2] * x[1:2, :]
          + b1_ref[...])                              # (16, TB)
    h1 = jnp.maximum(h1, 0.0)

    # Layer 2: (32,16) @ (16,TB) on the MXU, f32 accumulation.
    h2 = jnp.dot(w2_ref[...], h1, preferred_element_type=jnp.float32)
    h2 = jnp.maximum(h2 + b2_ref[...], 0.0)           # (32, TB)

    # Layer 3: (2,32) @ (32,TB).
    h3 = jnp.dot(w3_ref[...], h2, preferred_element_type=jnp.float32)
    o_ref[...] = (h3 + b3_ref[...]).astype(o_ref.dtype)   # (2, TB)


@functools.partial(jax.jit, static_argnames=("max_tile",))
def simple_generator_forward(x, params, *, max_tile=2048):
    """x: (B, 2) float32. params: PyTorch-style w (out,in), b (out,1)."""
    w1, b1 = params["w1"], params["b1"]   # (16, 2), (16, 1)
    w2, b2 = params["w2"], params["b2"]   # (32, 16), (32, 1)
    w3, b3 = params["w3"], params["b3"]   # (2, 32), (2, 1)

    B = x.shape[0]
    x_t = x.T                                          # (2, B): batch -> lanes

    # Lane-dense batch tile: multiple of 128, capped at max_tile; pad B up so
    # every tile is a full, unmasked tile (ragged tail handled by padding).
    tile = min(max_tile, pl.cdiv(B, 128) * 128)
    b_pad = pl.cdiv(B, tile) * tile
    if b_pad != B:
        x_t = jnp.pad(x_t, ((0, 0), (0, b_pad - B)))

    grid = (b_pad // tile,)
    full = lambda a: pl.BlockSpec(a.shape, lambda i: (0, 0))  # resident weights

    flops = 2 * B * (2 * 16 + 16 * 32 + 32 * 2)
    bytes_accessed = 4 * B * (2 + 2) + sum(
        4 * a.size for a in (w1, b1, w2, b2, w3, b3))

    out_t = pl.pallas_call(
        _mlp_kernel,
        out_shape=jax.ShapeDtypeStruct((2, b_pad), x.dtype),
        grid=grid,
        in_specs=[
            pl.BlockSpec((2, tile), lambda i: (0, i)),   # x_t: tiled over batch
            full(w1), full(b1),
            full(w2), full(b2),
            full(w3), full(b3),
        ],
        out_specs=pl.BlockSpec((2, tile), lambda i: (0, i)),
        compiler_params=pltpu.CompilerParams(
            dimension_semantics=("parallel",),           # megacore on v7x
            vmem_limit_bytes=32 * 1024 * 1024,
        ),
        cost_estimate=pl.CostEstimate(
            flops=flops, transcendentals=0, bytes_accessed=bytes_accessed),
    )(x_t, w1, b1, w2, b2, w3, b3)

    return out_t[:, :B].T                                # back to (B, 2)


def init_params(key):
    """nn.Linear-shaped params: fc1(2->16), fc2(16->32), fc3(32->2).

    Weights stored PyTorch-style (out, in); biases as (out, 1) columns so they
    broadcast along the lane (batch) axis inside the kernel.
    """
    def linear(key, fan_in, fan_out):
        kw, kb = jax.random.split(key)
        bound = 1.0 / jnp.sqrt(fan_in)
        w = jax.random.uniform(kw, (fan_out, fan_in), jnp.float32, -bound, bound)
        b = jax.random.uniform(kb, (fan_out, 1), jnp.float32, -bound, bound)
        return w, b

    k1, k2, k3 = jax.random.split(key, 3)
    w1, b1 = linear(k1, 2, 16)
    w2, b2 = linear(k2, 16, 32)
    w3, b3 = linear(k3, 32, 2)
    return {"w1": w1, "b1": b1, "w2": w2, "b2": b2, "w3": w3, "b3": b3}


def reference_forward(x, p):
    h = jnp.maximum(x @ p["w1"].T + p["b1"].T, 0.0)
    h = jnp.maximum(h @ p["w2"].T + p["b2"].T, 0.0)
    return h @ p["w3"].T + p["b3"].T


if __name__ == "__main__":
    key = jax.random.PRNGKey(0)
    kx, kp, kx2 = jax.random.split(key, 3)
    params = init_params(kp)

    # Small batch (single 128-lane tile after padding).
    B = 8
    x = jax.random.normal(kx, (B, 2), jnp.float32)
    out = jax.block_until_ready(simple_generator_forward(x, params))
    ref = reference_forward(x, params)
    assert out.shape == (B, 2), out.shape
    assert jnp.allclose(out, ref, atol=1e-5, rtol=1e-5)

    # Non-multiple-of-tile batch exercising grid > 1 + padded tail.
    B2 = 300
    x2 = jax.random.normal(kx2, (B2, 2), jnp.float32)
    out2 = jax.block_until_ready(
        simple_generator_forward(x2, params, max_tile=128))
    ref2 = reference_forward(x2, params)
    assert out2.shape == (B2, 2), out2.shape
    assert jnp.allclose(out2, ref2, atol=1e-5, rtol=1e-5)

    print("KERNEL_OK")
</pallas_src>

<mosaic_0001>
module attributes {stable_mosaic.version = 11 : i64} {
  func.func @_mlp_kernel(%arg0: i32, %arg1: memref<2x128xf32, #tpu.memory_space<vmem>>, %arg2: memref<16x2xf32, #tpu.memory_space<vmem>>, %arg3: memref<16x1xf32, #tpu.memory_space<vmem>>, %arg4: memref<32x16xf32, #tpu.memory_space<vmem>>, %arg5: memref<32x1xf32, #tpu.memory_space<vmem>>, %arg6: memref<2x32xf32, #tpu.memory_space<vmem>>, %arg7: memref<2x1xf32, #tpu.memory_space<vmem>>, %arg8: memref<2x128xf32, #tpu.memory_space<vmem>>) attributes {dimension_semantics = [#tpu.dimension_semantics<parallel>], iteration_bounds = array<i64: 1>, scalar_prefetch = 0 : i64, scratch_operands = 0 : i64, tpu.core_type = #tpu.core_type<tc>, window_params = [{transform_indices = @transform_0, window_bounds = array<i64: 2, 128>}, {pipeline_mode = #tpu.pipeline_mode<synchronous>, transform_indices = @transform_1, window_bounds = array<i64: 16, 2>}, {pipeline_mode = #tpu.pipeline_mode<synchronous>, transform_indices = @transform_2, window_bounds = array<i64: 16, 1>}, {pipeline_mode = #tpu.pipeline_mode<synchronous>, transform_indices = @transform_3, window_bounds = array<i64: 32, 16>}, {pipeline_mode = #tpu.pipeline_mode<synchronous>, transform_indices = @transform_4, window_bounds = array<i64: 32, 1>}, {pipeline_mode = #tpu.pipeline_mode<synchronous>, transform_indices = @transform_5, window_bounds = array<i64: 2, 32>}, {pipeline_mode = #tpu.pipeline_mode<synchronous>, transform_indices = @transform_6, window_bounds = array<i64: 2, 1>}, {transform_indices = @transform_7, window_bounds = array<i64: 2, 128>}]} {
    %c0 = arith.constant 0 : index
    %c0_0 = arith.constant 0 : index
    %0 = vector.load %arg1[%c0, %c0_0] : memref<2x128xf32, #tpu.memory_space<vmem>>, vector<2x128xf32>
    %c0_1 = arith.constant 0 : index
    %c0_2 = arith.constant 0 : index
    %1 = vector.load %arg2[%c0_1, %c0_2] : memref<16x2xf32, #tpu.memory_space<vmem>>, vector<16x1xf32>
    %2 = vector.extract_strided_slice %0 {offsets = [0, 0], sizes = [1, 128], strides = [1, 1]} : vector<2x128xf32> to vector<1x128xf32>
    %3 = vector.broadcast %1 : vector<16x1xf32> to vector<16x128xf32>
    %4 = vector.broadcast %2 : vector<1x128xf32> to vector<16x128xf32>
    %5 = arith.mulf %3, %4 : vector<16x128xf32>
    %c0_3 = arith.constant 0 : index
    %c1 = arith.constant 1 : index
    %6 = vector.load %arg2[%c0_3, %c1] : memref<16x2xf32, #tpu.memory_space<vmem>>, vector<16x1xf32>
    %7 = vector.extract_strided_slice %0 {offsets = [1, 0], sizes = [1, 128], strides = [1, 1]} : vector<2x128xf32> to vector<1x128xf32>
    %8 = vector.broadcast %6 : vector<16x1xf32> to vector<16x128xf32>
    %9 = vector.broadcast %7 : vector<1x128xf32> to vector<16x128xf32>
    %10 = arith.mulf %8, %9 : vector<16x128xf32>
    %11 = arith.addf %5, %10 : vector<16x128xf32>
    %c0_4 = arith.constant 0 : index
    %c0_5 = arith.constant 0 : index
    %12 = vector.load %arg3[%c0_4, %c0_5] : memref<16x1xf32, #tpu.memory_space<vmem>>, vector<16x1xf32>
    %13 = vector.broadcast %12 : vector<16x1xf32> to vector<16x128xf32>
    %14 = arith.addf %11, %13 : vector<16x128xf32>
    %cst = arith.constant 0.000000e+00 : f32
    %15 = vector.broadcast %cst : f32 to vector<16x128xf32>
    %16 = arith.maximumf %14, %15 : vector<16x128xf32>
    %c0_6 = arith.constant 0 : index
    %c0_7 = arith.constant 0 : index
    %17 = vector.load %arg4[%c0_6, %c0_7] : memref<32x16xf32, #tpu.memory_space<vmem>>, vector<32x16xf32>
    %cst_8 = arith.constant dense<0.000000e+00> : vector<32x128xf32>
    %18 = tpu.matmul %17, %16, %cst_8 {dimension_numbers = #tpu.dot_dimension_numbers<[1], [0], [0], [1], [0, 0, 1, 1], [], []>} : vector<32x16xf32>, vector<16x128xf32>, vector<32x128xf32> -> vector<32x128xf32>
    %c0_9 = arith.constant 0 : index
    %c0_10 = arith.constant 0 : index
    %19 = vector.load %arg5[%c0_9, %c0_10] : memref<32x1xf32, #tpu.memory_space<vmem>>, vector<32x1xf32>
    %20 = vector.broadcast %19 : vector<32x1xf32> to vector<32x128xf32>
    %21 = arith.addf %18, %20 : vector<32x128xf32>
    %cst_11 = arith.constant 0.000000e+00 : f32
    %22 = vector.broadcast %cst_11 : f32 to vector<32x128xf32>
    %23 = arith.maximumf %21, %22 : vector<32x128xf32>
    %c0_12 = arith.constant 0 : index
    %c0_13 = arith.constant 0 : index
    %24 = vector.load %arg6[%c0_12, %c0_13] : memref<2x32xf32, #tpu.memory_space<vmem>>, vector<2x32xf32>
    %cst_14 = arith.constant dense<0.000000e+00> : vector<2x128xf32>
    %25 = tpu.matmul %24, %23, %cst_14 {dimension_numbers = #tpu.dot_dimension_numbers<[1], [0], [0], [1], [0, 0, 1, 1], [], []>} : vector<2x32xf32>, vector<32x128xf32>, vector<2x128xf32> -> vector<2x128xf32>
    %c0_15 = arith.constant 0 : index
    %c0_16 = arith.constant 0 : index
    %26 = vector.load %arg7[%c0_15, %c0_16] : memref<2x1xf32, #tpu.memory_space<vmem>>, vector<2x1xf32>
    %27 = vector.broadcast %26 : vector<2x1xf32> to vector<2x128xf32>
    %28 = arith.addf %25, %27 : vector<2x128xf32>
    %c0_17 = arith.constant 0 : index
    %c0_18 = arith.constant 0 : index
    %29 = vector.load %arg8[%c0_17, %c0_18] : memref<2x128xf32, #tpu.memory_space<vmem>>, vector<2x128xf32>
    tpu.vector_store %arg8[%c0_17, %c0_18], %28 {strides = array<i32>} : memref<2x128xf32, #tpu.memory_space<vmem>>, vector<2x128xf32>,
    return
  }
  func.func @transform_0(%arg0: i32) -> (i32, i32) {
    %c0_i32 = arith.constant 0 : i32
    %c0_i32_0 = arith.constant 0 : i32
    return %c0_i32, %arg0 : i32, i32
  }
  func.func @transform_1(%arg0: i32) -> (i32, i32) {
    %c0_i32 = arith.constant 0 : i32
    %c0_i32_0 = arith.constant 0 : i32
    %c0_i32_1 = arith.constant 0 : i32
    return %c0_i32, %c0_i32_0 : i32, i32
  }
  func.func @transform_2(%arg0: i32) -> (i32, i32) {
    %c0_i32 = arith.constant 0 : i32
    %c0_i32_0 = arith.constant 0 : i32
    %c0_i32_1 = arith.constant 0 : i32
    return %c0_i32, %c0_i32_0 : i32, i32
  }
  func.func @transform_3(%arg0: i32) -> (i32, i32) {
    %c0_i32 = arith.constant 0 : i32
    %c0_i32_0 = arith.constant 0 : i32
    %c0_i32_1 = arith.constant 0 : i32
    return %c0_i32, %c0_i32_0 : i32, i32
  }
  func.func @transform_4(%arg0: i32) -> (i32, i32) {
    %c0_i32 = arith.constant 0 : i32
    %c0_i32_0 = arith.constant 0 : i32
    %c0_i32_1 = arith.constant 0 : i32
    return %c0_i32, %c0_i32_0 : i32, i32
  }
  func.func @transform_5(%arg0: i32) -> (i32, i32) {
    %c0_i32 = arith.constant 0 : i32
    %c0_i32_0 = arith.constant 0 : i32
    %c0_i32_1 = arith.constant 0 : i32
    return %c0_i32, %c0_i32_0 : i32, i32
  }
  func.func @transform_6(%arg0: i32) -> (i32, i32) {
    %c0_i32 = arith.constant 0 : i32
    %c0_i32_0 = arith.constant 0 : i32
    %c0_i32_1 = arith.constant 0 : i32
    return %c0_i32, %c0_i32_0 : i32, i32
  }
  func.func @transform_7(%arg0: i32) -> (i32, i32) {
    %c0_i32 = arith.constant 0 : i32
    %c0_i32_0 = arith.constant 0 : i32
    return %c0_i32, %arg0 : i32, i32
  }
}

</mosaic_0001>

<bundles_post_ra>
// kernel: simple_generator_forward.1
= control target key start
LH: loop header
LB: loop body
LE: loop exit
PB: predicated region body
PF: predicated region fallthrough
CT: control target
= control target key end

     0   :  { %v348_v0 = vmov 1   ;;  %v349_v1 = vmov 0   ;;  %vm105_vm0 = vcmask 130048   ;;  %v39_v12 = vlaneseq  ;;  %s445_s1 = inlined_call_operand.vmem [shape: f32[16,2], index: 1, kind: input, shape index: {}]   ;;  %s446_s2 = inlined_call_operand.vmem [shape: f32[16,1], index: 2, kind: input, shape index: {}]   ;;  %s447_s4 = inlined_call_operand.vmem [shape: f32[32,1], index: 4, kind: input, shape index: {}]   ;;  %s448_s6 = inlined_call_operand.vmem [shape: f32[2,1], index: 6, kind: input, shape index: {}]   ;;  %s449_s3 = inlined_call_operand.vmem [shape: f32[32,16], index: 3, kind: input, shape index: {}]   ;;  %s450_s0 = inlined_call_operand.vmem [shape: f32[2,128], index: 0, kind: input, shape index: {}]   ;;  %s451_s5 = inlined_call_operand.vmem [shape: f32[2,32], index: 5, kind: input, shape index: {}]   ;;  %s452_s7 = inlined_call_operand.vmem [shape: f32[2,128], index: 7, kind: output, shape index: {}]  }
   0x1   :  { %346 = vset.pattern.permute.xlu1 %v348_v0  ;;  %345 = vset.pattern.permute.xlu0 %v349_v1  ;;  %v27_v2 = vld [vmem:[%s445_s1] sm:$0xff]  ;;  %v28_v3 = vld [vmem:[%s445_s1 + $0x8] sm:$0xff]  ;;  %v83_v8 = vld [vmem:[%s447_s4 + $0x10] sm:$0xff]  ;;  %v350_v39 = vmov 0.0|0.0   ;;  %vm351_vm1 = vmmov 0   ;;  %v352_v40 = vmov 0.0  }
   0x2   :  { %46 = vperm.xlu1 %346, %v27_v2   ;;  %31 = vperm.xlu0 %345, %v27_v2   ;;  %v61_v4 = vld [vmem:[%s446_s2] sm:$0xff]  ;;  %v62_v5 = vld [vmem:[%s446_s2 + $0x8] sm:$0xff]  ;;  %v84_v9 = vld [vmem:[%s447_s4 + $0x18] sm:$0xff]  ;;  %v40_v13 = vshrl.u32 %v39_v12, 7  ;;  %vm214_vm2 = vcmask 261120  }
   0x3   :  { %v81_v6 = vld [vmem:[%s447_s4] sm:$0xff]  ;;  %v82_v7 = vld [vmem:[%s447_s4 + $0x8] sm:$0xff]  ;;  %v79_v37 = vld [vmem:[%s449_s3 + $0x10] sm:$0xff]  ;;  %334 = vmatprep.subr.bf16.mxu1 %v350_v39  ;;  %327 = vmatprep.mubr.msk.f32.mxu1 %vm351_vm1, %v352_v40 }
   0x4   :  { %v208_v10 = vld [vmem:[%s448_s6] sm:$0x3]  ;;  %v55_v14 = vsub.s32 1, %v40_v13  ;;  %v41_v15 = vsub.s32 0, %v40_v13  ;;  %v78_v36 = vld [vmem:[%s449_s3 + $0x8] sm:$0xff]  ;;  %v80_v38 = vld [vmem:[%s449_s3 + $0x18] sm:$0xff] }
   0x5   :  { %v77_v11 = vld [vmem:[%s449_s3] sm:$0xff] }
   0x6   :  { %50 = vperm.xlu1 %346, %v28_v3   ;;  %36 = vperm.xlu0 %345, %v28_v3   ;;  %v26_v16 = vld [vmem:[%s450_s0] sm:$0x3] }
   0x7   :  { %313 = vmatprep.mubr.msk.f32.mxu0 %vm105_vm0, %v77_v11  ;;  %v56_v17 = vrot.slane %v26_v16, %v55_v14  ;;  %v42_v18 = vrot.slane %v26_v16, %v41_v15  ;;  %v207_v59 = vld [vmem:[%s451_s5] sm:$0x3] }
   0xa   :  { %347 = vset.pattern.permute.xlu1 %v349_v1  ;;  %65 = vperm.xlu0 %345, %v61_v4  }
   0xb   :  { %70 = vperm.xlu1 %347, %v62_v5  }
   0xe   :  { %87 = vperm.xlu0 %345, %v81_v6  }
   0xf   :  { %92 = vperm.xlu1 %347, %v82_v7  }
  0x12   :  { %97 = vperm.xlu0 %345, %v83_v8  }
  0x13   :  { %102 = vperm.xlu1 %347, %v84_v9  }
  0x16   :  { %211 = vperm.xlu0 %345, %v208_v10  }
  0x81   :  { %v47_v19 = vpop.permute.xlu1 %46  ;;  %v32_v20 = vpop.permute.xlu0 %31 }
  0x82   :  { %v57_v21 = vmul.f32 %v56_v17, %v47_v19  ;;  %v43_v22 = vmul.f32 %v42_v18, %v32_v20 }
  0x84   :  { %v59_v27 = vadd.f32 %v57_v21, %v43_v22 }
  0x85   :  { %v51_v23 = vpop.permute.xlu1 %50  ;;  %v37_v24 = vpop.permute.xlu0 %36 }
  0x86   :  { %v58_v25 = vmul.f32 %v56_v17, %v51_v23  ;;  %v44_v26 = vmul.f32 %v42_v18, %v37_v24 }
  0x88   :  { %v60_v28 = vadd.f32 %v58_v25, %v44_v26 }
  0x89   :  { %v66_v29 = vpop.permute.xlu0 %65 }
  0x8a   :  { %v73_v30 = vadd.f32 %v66_v29, %v59_v27  ;;  %v71_v31 = vpop.permute.xlu1 %70 }
  0x8b   :  { %v74_v32 = vadd.f32 %v71_v31, %v60_v28 }
  0x8c   :  { %v75_v33 = vmax.f32 %v73_v30, 0.0 }
  0x8d   :  { %v76_v34 = vmax.f32 %v74_v32, 0.0  ;;  %v88_v42 = vpop.permute.xlu0 %87 }
  0x8e   :  { %v93_v41 = vpop.permute.xlu1 %92 }
  0x8f   :  { %v330_v35 = vpack.c.bf16 %v76_v34, %v75_v33 }
  0x91   :  { %331 = vmatprep.subr.bf16.mxu0 %v330_v35  ;;  %v98_v51 = vpop.permute.xlu0 %97 }
  0x92   :  { %333 = vmatpush3.bf16.msra.mxu0 %v330_v35  ;;  %v103_v48 = vpop.permute.xlu1 %102 }
  0x95   :  { %314 = vmatmul.mubr.msk.f32.vlgmr.msra.gmra.mrb[0].mxu0 %vm105_vm0, %v78_v36  ;;  %v212_v60 = vpop.permute.xlu0 %211 }
  0x96   :  { %316 = vmatprep.mubr.msk.f32.mxu0 %vm105_vm0, %v79_v37 }
  0x99   :  { %317 = vmatmul.mubr.msk.f32.gmra.mrb[2].mxu0 %vm105_vm0, %v80_v38 }
 0x168   :  { %v315_v43 = vpop.f32.mrb[0].mxu0 }
 0x169   :  { %v190_v44 = vadd.f32 %v315_v43, %v93_v41  ;;  %v184_v45 = vpop.f32.mrb[1].mxu0 }
 0x16a   :  { %v185_v46 = vadd.f32 %v184_v45, %v88_v42 }
 0x16b   :  { %v204_v47 = vmax.f32 %v190_v44, 0.0 }
 0x16c   :  { %v203_v49 = vmax.f32 %v185_v46, 0.0  ;;  %v318_v50 = vpop.f32.mrb[2].mxu0 }
 0x16d   :  { %v200_v52 = vadd.f32 %v318_v50, %v103_v48  ;;  %v194_v53 = vpop.f32.mrb[3].mxu0 }
 0x16e   :  { %v195_v54 = vadd.f32 %v194_v53, %v98_v51  ;;  %v335_v55 = vpack.c.bf16 %v204_v47, %v203_v49 }
 0x16f   :  { %v206_v56 = vmax.f32 %v200_v52, 0.0 }
 0x170   :  { %v205_v57 = vmax.f32 %v195_v54, 0.0  ;;  %336 = vmatpush3.bf16.msra.mxu1 %v335_v55 }
 0x171   :  { %337 = vmatprep.subr.bf16.mxu1 %v350_v39 }
 0x172   :  { %v338_v58 = vpack.c.bf16 %v206_v56, %v205_v57 }
 0x174   :  { %339 = vmatpush3.bf16.msra.mxu1 %v338_v58 }
 0x177   :  { %328 = vmatmul.mubr.msk.f32.vlgmr.msra.gmra.mrb[0].mxu1 %vm214_vm2, %v207_v59 }
 0x24a   :  { %v284_v61 = vpop.f32.mrb[0].mxu1 }
 0x24b   :  { %v285_v62 = vadd.f32 %v284_v61, %v212_v60  ;;  %v329_v63 = vpop.f32.mrb[1].mxu1 }
 0x24d   :  { %288 = vst [vmem:[%s452_s7] sm:$0x3] %v285_v62 }

</bundles_post_ra>
